<compile_context>
chip_gen: v7x
topology: tpu7x:2x2x1
jax: 0.10.0
libtpu: 0.0.40
codegen_flags: <defaults>
</compile_context>

<pallas_src>
import functools
import math

import jax
import jax.numpy as jnp
from jax.experimental import pallas as pl
from jax.experimental.pallas import tpu as pltpu


def _round_up(x, m):
    return ((x + m - 1) // m) * m


def _cdiv(a, b):
    return -(-a // b)


def _maybe_pad(a, target_shape):
    """Pad `a` up to target_shape, skipping the op entirely if already aligned."""
    pads = tuple((0, t - s) for s, t in zip(a.shape, target_shape))
    if all(p == (0, 0) for p in pads):
        return a
    return jnp.pad(a, pads)


def _vmem_limit_bytes():
    """Generation-aware scoped-VMEM limit.

    Cap at 56 MiB and keep ~25% headroom below the physical per-core VMEM so
    v7x (64 MiB/TC) still has room for compiler-internal scratch; on
    v5e/v6e (128 MiB) this resolves to the 56 MiB cap, which is ample.
    """
    cap = None
    try:
        cap = int(getattr(pltpu.get_tpu_info(), "vmem_capacity_bytes", 0)) or None
    except Exception:
        cap = None
    if cap is None:
        cap = 64 * 1024 * 1024  # conservative: smallest per-core VMEM (v7x)
    return min(56 * 1024 * 1024, (cap * 3) // 4)


def _plan_tiles(B8, IN_p, OUT_p, in_itemsize, out_itemsize, b_tile, vmem_limit):
    """Pick (TB, TN, n_btiles, n_ntiles) so the double-buffered working set fits."""

    def working_set(tb, tn):
        # Every operand is double-buffered by the BlockSpec pipeline.
        return 2 * (
            tb * IN_p * in_itemsize      # x tile
            + IN_p * tn * in_itemsize    # weight tile
            + tb * tn * out_itemsize     # output tile
            + tn * 4                     # bias tile (f32)
        )

    limit = int(0.8 * vmem_limit)  # extra headroom for pipeline bookkeeping

    # Batch tiles: balanced, sublane-aligned, no larger than b_tile.
    n_btiles = _cdiv(B8, b_tile)
    TB = _round_up(_cdiv(B8, n_btiles), 8)

    # OUT tiles: keep the full weight block resident if it fits; otherwise
    # split OUT into the largest 128-lane-aligned tile that fits.
    TN = OUT_p
    while working_set(TB, TN) > limit and TN > 128:
        TN -= 128
    n_ntiles = _cdiv(OUT_p, TN)
    TN = _round_up(_cdiv(OUT_p, n_ntiles), 128)  # rebalance (never grows ws)

    # Last resort for enormous IN: shrink the batch tile too.
    while working_set(TB, TN) > limit and TB > 8:
        TB = max(8, _round_up(TB // 2, 8))
    n_btiles = _cdiv(B8, TB)
    TB = _round_up(_cdiv(B8, n_btiles), 8)       # rebalance

    return TB, TN, n_btiles, n_ntiles


def _ensemble_fc_kernel(x_ref, w_ref, b_ref, o_ref, *, precision):
    # x_ref: (TB, IN_p), w_ref: (IN_p, TN), b_ref: (1, TN), o_ref: (TB, TN)
    acc = jnp.dot(
        x_ref[...],
        w_ref[...],
        preferred_element_type=jnp.float32,
        precision=precision,
    )
    o_ref[...] = (acc + b_ref[...].astype(jnp.float32)).astype(o_ref.dtype)


def ensemble_fc(
    x,
    weight,
    bias=None,
    *,
    b_tile=512,
    use_bf16=False,
    high_precision=False,
    out_dtype=None,
    force_pallas=False,
):
    """out[e] = x[e] @ weight[e] + bias[e]  (PETS Ensemble_FC_Layer.forward)."""
    E, B, IN = x.shape
    E_w, IN_w, OUT = weight.shape
    assert (E_w, IN_w) == (E, IN), "weight shape must be (E, IN, OUT)"
    out_dtype = jnp.dtype(out_dtype) if out_dtype is not None else jnp.dtype(x.dtype)

    if bias is None:
        bias = jnp.zeros((E, OUT), dtype=jnp.float32)

    # DEFAULT precision by default (HIGHEST costs 3-6x MXU passes for f32,
    # which hurts badly on v5e); bf16-storage path always uses native passes.
    precision = (
        jax.lax.Precision.HIGHEST if (high_precision and not use_bf16) else None
    )

    IN_p = _round_up(IN, 128)
    OUT_p = _round_up(OUT, 128)
    B8 = _round_up(B, 8)

    # Tiny layers: 128-lane padding inflates MXU work and ~0.35us/step grid
    # overhead dominates — XLA's batched matmul wins.  Dispatch there.
    if not force_pallas and E * B8 * IN_p * OUT_p < (1 << 21):
        out = jnp.einsum("ebi,eio->ebo", x, weight, precision=precision)
        return (out + bias[:, None, :]).astype(out_dtype)

    in_itemsize = 2 if use_bf16 else jnp.dtype(x.dtype).itemsize
    vmem_limit = _vmem_limit_bytes()
    TB, TN, n_btiles, n_ntiles = _plan_tiles(
        B8, IN_p, OUT_p, in_itemsize, out_dtype.itemsize, b_tile, vmem_limit
    )
    B_p = TB * n_btiles
    OUT_pp = TN * n_ntiles

    # Pad only when needed (skip the extra HBM copy for aligned shapes).
    x_p = _maybe_pad(x, (E, B_p, IN_p))
    w_p = _maybe_pad(weight, (E, IN_p, OUT_pp))
    b_p = _maybe_pad(bias.astype(jnp.float32), (E, OUT_pp)).reshape(E, 1, OUT_pp)

    if use_bf16:
        # Halve HBM traffic / VMEM footprint; the MXU is bf16-native on
        # v5e/v6e/v7x alike.  Accumulation and the bias epilogue stay f32.
        x_p = x_p.astype(jnp.bfloat16)
        w_p = w_p.astype(jnp.bfloat16)

    itemsize = lambda a: jnp.dtype(a.dtype).itemsize
    cost = pl.CostEstimate(
        flops=2 * E * B_p * IN_p * OUT_pp,
        transcendentals=0,
        bytes_accessed=(
            x_p.size * itemsize(x_p)
            + w_p.size * itemsize(w_p)
            + b_p.size * itemsize(b_p)
            + E * B_p * OUT_pp * out_dtype.itemsize
        ),
    )

    out_p = pl.pallas_call(
        functools.partial(_ensemble_fc_kernel, precision=precision),
        out_shape=jax.ShapeDtypeStruct((E, B_p, OUT_pp), out_dtype),
        grid_spec=pltpu.PrefetchScalarGridSpec(
            num_scalar_prefetch=0,
            # n (OUT tiles) is innermost: x stays resident across n; when
            # n_ntiles == 1 the weight block is also resident across all b.
            grid=(E, n_btiles, n_ntiles),
            in_specs=[
                # x: ignores the n axis -> not re-DMA'd per OUT tile.
                pl.BlockSpec((pl.Squeezed(), TB, IN_p), lambda e, b, n: (e, b, 0)),
                # weight: ignores the b axis -> resident across inner B tiles
                # whenever OUT is untiled.
                pl.BlockSpec((pl.Squeezed(), IN_p, TN), lambda e, b, n: (e, 0, n)),
                # bias: tiny, follows the OUT tile.
                pl.BlockSpec((pl.Squeezed(), 1, TN), lambda e, b, n: (e, 0, n)),
            ],
            out_specs=pl.BlockSpec(
                (pl.Squeezed(), TB, TN), lambda e, b, n: (e, b, n)
            ),
        ),
        compiler_params=pltpu.CompilerParams(
            # No reduction axis in the grid -> every step independent; all
            # axes "parallel" so v7x can shard E x b x n across its 2 TCs.
            dimension_semantics=("parallel", "parallel", "parallel"),
            vmem_limit_bytes=vmem_limit,
        ),
        cost_estimate=cost,
    )(x_p, w_p, b_p)

    # Strip padding back to the PyTorch output shape.
    return out_p[:, :B, :OUT]


def init_params(key, ensemble_size, in_features, out_features):
    # torch.nn.init.xavier_uniform_ on a (E, IN, OUT) tensor:
    #   fan_in = IN * OUT, fan_out = E * OUT -> bound = sqrt(6/(fan_in+fan_out))
    fan_in = in_features * out_features
    fan_out = ensemble_size * out_features
    bound = math.sqrt(6.0 / (fan_in + fan_out))
    weight = jax.random.uniform(
        key,
        (ensemble_size, in_features, out_features),
        dtype=jnp.float32,
        minval=-bound,
        maxval=bound,
    )
    bias = jnp.zeros((ensemble_size, out_features), dtype=jnp.float32)
    return weight, bias


if __name__ == "__main__":
    key = jax.random.PRNGKey(0)

    def reference(x, w, b):
        return (
            jnp.einsum("ebi,eio->ebo", x, w, precision=jax.lax.Precision.HIGHEST)
            + b[:, None, :]
        )

    # --- Test 1: tiny PETS layer, forced through the Pallas path ------------
    E, B, IN, OUT = 4, 8, 32, 32
    k1, k2, key = jax.random.split(key, 3)
    x = jax.random.normal(k1, (E, B, IN), dtype=jnp.float32)
    w, b = init_params(k2, E, IN, OUT)
    ref = reference(x, w, b)

    out = jax.block_until_ready(
        ensemble_fc(x, w, b, force_pallas=True, high_precision=True)
    )
    assert out.shape == (E, B, OUT)
    assert jnp.allclose(out, ref, atol=1e-5, rtol=1e-5)

    # Default dispatch for this tiny size goes to XLA einsum — check parity.
    out_xla = jax.block_until_ready(ensemble_fc(x, w, b, high_precision=True))
    assert jnp.allclose(out_xla, ref, atol=1e-5, rtol=1e-5)

    # --- Test 2: modest, non-aligned shapes (padding + balanced B tiles) ----
    E, B, IN, OUT = 2, 40, 160, 272
    k1, k2, key = jax.random.split(key, 3)
    x = jax.random.normal(k1, (E, B, IN), dtype=jnp.float32)
    w, b = init_params(k2, E, IN, OUT)
    ref = reference(x, w, b)

    # Default f32 path (MXU DEFAULT precision -> moderate tolerance).
    out = jax.block_until_ready(ensemble_fc(x, w, b))
    assert out.shape == (E, B, OUT)
    assert jnp.allclose(out, ref, atol=2e-2, rtol=2e-2)

    # High-precision f32 path (bit-close parity with torch.bmm float32).
    out_hp = jax.block_until_ready(ensemble_fc(x, w, b, high_precision=True))
    assert jnp.allclose(out_hp, ref, atol=1e-5, rtol=1e-5)

    # bf16 storage + bf16 output path — bandwidth optimization (all gens).
    out_bf16 = jax.block_until_ready(
        ensemble_fc(x, w, b, use_bf16=True, out_dtype=jnp.bfloat16)
    )
    assert out_bf16.shape == (E, B, OUT)
    assert out_bf16.dtype == jnp.bfloat16
    assert jnp.allclose(out_bf16.astype(jnp.float32), ref, atol=5e-2, rtol=5e-2)

    print("KERNEL_OK")
</pallas_src>

<mosaic_0001>
module attributes {stable_mosaic.version = 11 : i64} {
  func.func @_ensemble_fc_kernel(%arg0: i32, %arg1: i32, %arg2: i32, %arg3: memref<1x8x128xf32, #tpu.memory_space<vmem>>, %arg4: memref<1x128x128xf32, #tpu.memory_space<vmem>>, %arg5: memref<1x1x128xf32, #tpu.memory_space<vmem>>, %arg6: memref<1x8x128xf32, #tpu.memory_space<vmem>>) attributes {dimension_semantics = [#tpu.dimension_semantics<parallel>, #tpu.dimension_semantics<parallel>, #tpu.dimension_semantics<parallel>], iteration_bounds = array<i64: 4, 1, 1>, scalar_prefetch = 0 : i64, scratch_operands = 0 : i64, tpu.core_type = #tpu.core_type<tc>, window_params = [{transform_indices = @transform_0, window_bounds = array<i64: 1, 8, 128>}, {transform_indices = @transform_1, window_bounds = array<i64: 1, 128, 128>}, {transform_indices = @transform_2, window_bounds = array<i64: 1, 1, 128>}, {transform_indices = @transform_3, window_bounds = array<i64: 1, 8, 128>}]} {
    %c0 = arith.constant 0 : index
    %c0_0 = arith.constant 0 : index
    %c0_1 = arith.constant 0 : index
    %0 = vector.load %arg3[%c0, %c0_0, %c0_1] : memref<1x8x128xf32, #tpu.memory_space<vmem>>, vector<1x8x128xf32>
    %1 = vector.shape_cast %0 : vector<1x8x128xf32> to vector<8x128xf32>
    %c0_2 = arith.constant 0 : index
    %c0_3 = arith.constant 0 : index
    %c0_4 = arith.constant 0 : index
    %2 = vector.load %arg4[%c0_2, %c0_3, %c0_4] : memref<1x128x128xf32, #tpu.memory_space<vmem>>, vector<1x128x128xf32>
    %3 = vector.shape_cast %2 : vector<1x128x128xf32> to vector<128x128xf32>
    %cst = arith.constant dense<0.000000e+00> : vector<8x128xf32>
    %4 = tpu.matmul %1, %3, %cst {dimension_numbers = #tpu.dot_dimension_numbers<[1], [0], [0], [1], [0, 0, 1, 1], [], []>, precision = #tpu.contract_precision<fp32>} : vector<8x128xf32>, vector<128x128xf32>, vector<8x128xf32> -> vector<8x128xf32>
    %c0_5 = arith.constant 0 : index
    %c0_6 = arith.constant 0 : index
    %c0_7 = arith.constant 0 : index
    %5 = vector.load %arg5[%c0_5, %c0_6, %c0_7] : memref<1x1x128xf32, #tpu.memory_space<vmem>>, vector<1x1x128xf32>
    %6 = vector.shape_cast %5 : vector<1x1x128xf32> to vector<1x128xf32>
    %7 = vector.broadcast %6 : vector<1x128xf32> to vector<8x128xf32>
    %8 = arith.addf %4, %7 : vector<8x128xf32>
    %c0_8 = arith.constant 0 : index
    %c0_9 = arith.constant 0 : index
    %c0_10 = arith.constant 0 : index
    %9 = vector.load %arg6[%c0_8, %c0_9, %c0_10] : memref<1x8x128xf32, #tpu.memory_space<vmem>>, vector<1x8x128xf32>
    %10 = vector.shape_cast %9 : vector<1x8x128xf32> to vector<8x128xf32>
    %11 = vector.shape_cast %8 : vector<8x128xf32> to vector<1x8x128xf32>
    tpu.vector_store %arg6[%c0_8, %c0_9, %c0_10], %11 {strides = array<i32>} : memref<1x8x128xf32, #tpu.memory_space<vmem>>, vector<1x8x128xf32>,
    return
  }
  func.func @transform_0(%arg0: i32, %arg1: i32, %arg2: i32) -> (i32, i32, i32) {
    %c0_i32 = arith.constant 0 : i32
    %c0_i32_0 = arith.constant 0 : i32
    return %arg0, %arg1, %c0_i32 : i32, i32, i32
  }
  func.func @transform_1(%arg0: i32, %arg1: i32, %arg2: i32) -> (i32, i32, i32) {
    %c0_i32 = arith.constant 0 : i32
    %c0_i32_0 = arith.constant 0 : i32
    return %arg0, %c0_i32, %arg2 : i32, i32, i32
  }
  func.func @transform_2(%arg0: i32, %arg1: i32, %arg2: i32) -> (i32, i32, i32) {
    %c0_i32 = arith.constant 0 : i32
    %c0_i32_0 = arith.constant 0 : i32
    return %arg0, %c0_i32, %arg2 : i32, i32, i32
  }
  func.func @transform_3(%arg0: i32, %arg1: i32, %arg2: i32) -> (i32, i32, i32) {
    %c0_i32 = arith.constant 0 : i32
    return %arg0, %arg1, %arg2 : i32, i32, i32
  }
}

</mosaic_0001>

<bundles_post_ra>
// kernel: tpu_custom_call.1
= control target key start
LH: loop header
LB: loop body
LE: loop exit
PB: predicated region body
PF: predicated region fallthrough
CT: control target
= control target key end

     0   :  { %8 = vsyncpa [#allocation3], 0  ;;  %s2314_s0 = inlined_call_operand.hbm [shape: f32[4,8,128], index: 0, kind: input, shape index: {}]   ;;  %s2315_s1 = inlined_call_operand.hbm [shape: f32[4,128,128], index: 1, kind: input, shape index: {}]   ;;  %s2316_s2 = inlined_call_operand.vmem [shape: f32[4,1,128], index: 2, kind: input, shape index: {}]   ;;  %s2317_s3 = inlined_call_operand.hbm [shape: f32[4,8,128], index: 3, kind: output, shape index: {}]  }
   0x1   :  { %10 = vsyncpa [#allocation3 + $0x1], 0 }
   0x2   :  { %11 = vsyncpa [#allocation6], 0 }
   0x3   :  { %13 = vsyncpa [#allocation6 + $0x1], 0 }
   0x4   :  { %14 = vsyncpa [#allocation4], 0 }
   0x5   :  { %16 = vsyncpa [#allocation4 + $0x1], 0  ;;  %s1816_s12 = smov 0   ;;  %s1818_s13 = smov 0  }
   0x6   :  { %s1820_s14 = smov 0   ;;  %s1822_s15 = smov 0  }
   0x7   :  { %s1824_s16 = smov 0   ;;  %s1826_s17 = smov 0  }
   0x8 LB: > { %s1083_s18 = sadd.s32 4294967295, %s1786_s17   ;;  %s1084_s19 = sadd.s32 4294967294, %s1786_s17   ;;  %s1786_s17 = sphi %s1826_s17, %s22_s17   ;;  %s1782_s16 = sphi %s1824_s16, %s2335_s16   ;;  %s1778_s15 = sphi %s1822_s15, %s2334_s15   ;;  %s1774_s14 = sphi %s1820_s14, %s2333_s14   ;;  %s1770_s13 = sphi %s1818_s13, %s2332_s13   ;;  %s1766_s12 = sphi %s1816_s12, %s2331_s12  }
   0x9   : > { %s41_s20 = sadd.s32 1, %s1782_s16  ;;  %s50_s21 = sadd.s32 1, %s1774_s14 }
   0xa   : > { %p43_p0 = scmp.ge.s32.totalorder %s41_s20, 4  ;;  %p57_p1 = scmp.ne.s32.totalorder %s1774_s14, %s1770_s13 }
   0xb   : > { %p58_p2 = scmp.eq.s32.totalorder %s1786_s17, 0  ;;  %p63_p3 = scmp.ne.s32.totalorder %s1770_s13, %s1766_s12 }
   0xc   : > { %s2337_s20 = smov (%p43_p0, %s41_s20), 0  ;;  %p64_p5 = scmp.eq.s32.totalorder %s1083_s18, 0 }
   0xd   : > { %p1857_p4 = por %p58_p2, %p57_p1  ;;  %s45_s23 = ssub.s32 %s1782_s16, %s2337_s20 }
   0xe   : > { %p147_p6 = scmp.eq.s32.totalorder %s1083_s18, 3  ;;  %p48_p7 = scmp.eq.s32.totalorder %s45_s23, 0 }
   0xf   : > { %p1863_p8 = por %p64_p5, %p63_p3  ;;  %p153_p10 = scmp.eq.s32.totalorder %s1084_s19, 3 }
  0x10   : > { %p1867_p9 = por %p147_p6, %p57_p1  ;;  %p1585_p12 = scmp.lt.s32.totalorder %s1786_s17, 4 }
  0x11   : > { %s2321_s24 = scalar_select %p1863_p8, 1, 0 }
  0x12   : > { %s2322_s25 = scalar_select %p1867_p9, 1, 0 }
  0x13   : > { %s1872_s26 = scalar_select %p48_p7, %s1774_s14, %s50_s21  }
  0x14   : > { %p1874_p11 = por %p153_p10, %p63_p3  ;;  %s1880_s28 = sand.u32 1, %s1774_s14  }
  0x15   : > { %s1087_s29 = sshll.u32 %s1880_s28, 3  ;;  %s1088_s30 = sshll.u32 %s1782_s16, 7 }
  0x16   : > { %s2323_s27 = scalar_select %p1874_p11, 1, 0 }
  0x17   : > { %s1887_s6 = scalar_lea.hbm %s2314_s0, %s1088_s30  ;;  %s177_s7 = scalar_lea.vmem [#allocation2], %s1087_s29 }
  0x18   : > { %s185_s8 = sshll.u32 %s177_s7, 4  ;;  %p1893_p13 = pnand %p1585_p12, %p1857_p4  ;;  %s1889_s8 = int_to_ptr.vmem [resolvable:$true] %s185_s8 }
  0x19   : > { %s174_s10 = scalar_lea.sflag [#allocation3], %s1880_s28  ;;  %s1640_s11 = scalar_lea.hbm %s1887_s6, 128 }
  0x1a   : > { %p1641_p2 = scmp.ne.s32.totalorder %s1887_s6, %s1640_s11  ;;  %p1642_p3 = pneg %p1893_p13 }
  0x1b   : > { %s1645_s21 = scalar_lea.hbm %s2314_s0, 512  ;;  %p1646_p4 = scmp.lt.u32.totalorder %s1887_s6, %s2314_s0 }
  0x1c   : > { %p1643_p5 = pnand %p1642_p3, %p1641_p2  ;;  %p1647_p7 = scmp.lt.u32.totalorder %s1645_s21, %s1640_s11 }
  0x1d   : > { %p1649_p12 = scmp.lt.u32.totalorder %s1640_s11, %s1887_s6 }
  0x1e   : > { %p1644_p6 = pneg %p1643_p5  ;;  %p1648_p10 = por %p1647_p7, %p1646_p4 }
  0x20   : > { %p1650_p0 = por %p1649_p12, %p1648_p10 }
  0x22   : > { %p1651_p1 = pnand %p1650_p0, %p1644_p6 }
  0x24   : > { %1654 = shalt.err (!%p1651_p1)
}
  0x25   : > { %s1655_s29 = scalar_lea.vmem %s1889_s8, 128  ;;  %s1788_s30 = smov [#allocation2]  }
  0x26   : > { %p1656_p2 = scmp.ne.s32.totalorder %s1889_s8, %s1655_s29  ;;  %s1660_s4 = sshll.u32 %s1788_s30, 4  ;;  %s1661_s4 = int_to_ptr.vmem [resolvable:$false] %s1660_s4 }
  0x27   : > { %s1662_s5 = scalar_lea.vmem %s1661_s4, 256  ;;  %p1663_p9 = scmp.lt.s32.totalorder %s1889_s8, %s1661_s4 }
  0x28   : > { %p1658_p5 = pnand %p1656_p2, %p1642_p3  ;;  %p1664_p4 = scmp.lt.s32.totalorder %s1662_s5, %s1655_s29 }
  0x2a   : > { %p1659_p11 = pneg %p1658_p5  ;;  %p1665_p7 = por %p1664_p4, %p1663_p9 }
  0x2c   : > { %p1666_p10 = pnand %p1665_p7, %p1659_p11 }
  0x2e   : > { %1669 = shalt.err (!%p1666_p10)
}
  0x2f   : > { %1577 = dma.hbm_to_vmem [thread:$0]  (!%p1893_p13), %s1887_s6, 128, %s1889_s8, %s174_s10  }
  0x30   : > { %p2325_p0 = scmp.lt.s32.totalorder %s1786_s17, 5  ;;  %p2326_p1 = scmp.ge.s32.totalorder %s1786_s17, 1 }
  0x31   : > { %s1089_s11 = sshll.u32 %s1880_s28, 7  ;;  %s1101_s18 = sshll.u32 %s1782_s16, 11 }
  0x32   : > { %p1929_p6 = pnand %p2326_p1, %p2325_p0  ;;  %s1938_s22 = scalar_lea.hbm %s2315_s1, %s1101_s18 }
  0x33   : > { %s196_s23 = scalar_lea.vmem [#allocation5], %s1089_s11  ;;  %s193_s6 = scalar_lea.sflag [#allocation6], %s1880_s28 }
  0x34   : > { %s204_s29 = sshll.u32 %s196_s23, 4  ;;  %s1670_s8 = scalar_lea.hbm %s1938_s22, 2048  ;;  %s1940_s29 = int_to_ptr.vmem [resolvable:$true] %s204_s29 }
  0x35   : > { %p1671_p9 = scmp.ne.s32.totalorder %s1938_s22, %s1670_s8  ;;  %s1675_s4 = scalar_lea.hbm %s2315_s1, 8192 }
  0x36   : > { %p1676_p2 = scmp.lt.u32.totalorder %s1938_s22, %s2315_s1  ;;  %p1677_p5 = scmp.lt.u32.totalorder %s1675_s4, %s1670_s8 }
  0x37   : > { %p1673_p11 = pnand %p1671_p9, %p1642_p3  ;;  %p1679_p7 = scmp.lt.u32.totalorder %s1670_s8, %s1938_s22 }
  0x38   : > { %p1678_p4 = por %p1677_p5, %p1676_p2 }
  0x39   : > { %p1674_p12 = pneg %p1673_p11 }
  0x3a   : > { %p1680_p10 = por %p1679_p7, %p1678_p4 }
  0x3c   : > { %p1681_p0 = pnand %p1680_p10, %p1674_p12 }
  0x3e   : > { %1684 = shalt.err (!%p1681_p0)
}
  0x3f   : > { %s1685_s11 = scalar_lea.vmem %s1940_s29, 2048  ;;  %s1789_s19 = smov [#allocation5]  }
  0x40   : > { %p1686_p1 = scmp.ne.s32.totalorder %s1940_s29, %s1685_s11  ;;  %s1690_s21 = sshll.u32 %s1789_s19, 4  ;;  %s1691_s21 = int_to_ptr.vmem [resolvable:$false] %s1690_s21 }
  0x41   : > { %s1692_s23 = scalar_lea.vmem %s1691_s21, 4096  ;;  %p1693_p8 = scmp.lt.s32.totalorder %s1940_s29, %s1691_s21 }
  0x42   : > { %p1688_p9 = pnand %p1686_p1, %p1642_p3  ;;  %p1694_p2 = scmp.lt.s32.totalorder %s1692_s23, %s1685_s11 }
  0x44   : > { %p1689_p11 = pneg %p1688_p9  ;;  %p1695_p5 = por %p1694_p2, %p1693_p8 }
  0x46   : > { %p1696_p4 = pnand %p1695_p5, %p1689_p11 }
  0x48   : > { %1699 = shalt.err (!%p1696_p4)
}
  0x49   : > { %s1790_s8 = smov 128   ;;  %s1791_s10 = smov 8  }
  0x4a   : > { %1580 = dma.hbm_to_vmem [thread:$0]  (!%p1893_p13), %s1938_s22, 2048, %s1940_s29, %s193_s6, %s1790_s8, %s1790_s8, %s1791_s10  }
  0x4b   : > { %225 = sbr.rel (%p1929_p6) target bundleno = 416 (0x1a0), region = 32  ;;  %s1971_s30 = sand.u32 (!%p1929_p6), 1, %s1770_s13  }
  0x4c   : > { %s1093_s4 = sshll.u32 (!%p1929_p6), %s1971_s30, 3  ;;  %s228_s5 = scalar_lea.sflag (!%p1929_p6), [#allocation3], %s1971_s30 }
  0x4d   : > { %s1977_s18 = scalar_lea.vmem (!%p1929_p6), [#allocation2], %s1093_s4  ;;  %p2328_p8 = scmp.ne.s32.totalorder (!%p1929_p6), %s2321_s24, 0 }
  0x52   : > { %1753 = dma.done.wait (%p2328_p8), %s228_s5, 128  }
  0x53   : > { %1755 = vsyncadd (%p2328_p8), %s228_s5, 4294967168  ;;  %s1094_s28 = sshll.u32 %s1971_s30, 7  ;;  %s237_s9 = scalar_lea.sflag [#allocation6], %s1971_s30 }
  0x54   : > { %s1985_s7 = scalar_lea.vmem [#allocation5], %s1094_s28 }
  0x55   : > { %1757 = dma.done.wait (%p2328_p8), %s237_s9, 2048  }
  0x56   : > { %1759 = vsyncadd (%p2328_p8), %s237_s9, 4294965248  ;;  %v1792_v0 = vmov 0.0|0.0   ;;  %vm1793_vm0 = vmmov 0   ;;  %v1794_v1 = vmov 0.0   ;;  %v281_v2 = vld [vmem:[%s1985_s7] sm:$0xff]  ;;  %v282_v3 = vld [vmem:[%s1985_s7 + $0x8] sm:$0xff] }
  0x57   : > { %1414 = vmatprep.subr.bf16.mxu1 %v1792_v0  ;;  %1486 = vmatprep.subr.bf16.mxu0 %v1792_v0  ;;  %v283_v4 = vld [vmem:[%s1985_s7 + $0x10] sm:$0xff]  ;;  %v305_v5 = vand.u32 4294901760, %v281_v2  ;;  %v308_v6 = vand.u32 4294901760, %v282_v3  ;;  %v284_v7 = vld [vmem:[%s1985_s7 + $0x18] sm:$0xff]  ;;  %v285_v10 = vld [vmem:[%s1985_s7 + $0x20] sm:$0xff]  ;;  %p274_p13 = scmp.lt.s32.totalorder %s1778_s15, 3 }
  0x58   : > { %1236 = vmatprep.mubr.msk.f32.mxu1 %vm1793_vm0, %v1794_v1  ;;  %1341 = vmatprep.mubr.msk.f32.mxu0 %vm1793_vm0, %v1794_v1  ;;  %v311_v8 = vand.u32 4294901760, %v283_v4  ;;  %v314_v9 = vand.u32 4294901760, %v284_v7  ;;  %v286_v11 = vld [vmem:[%s1985_s7 + $0x28] sm:$0xff]  ;;  %v317_v14 = vand.u32 4294901760, %v285_v10  ;;  %v287_v16 = vld [vmem:[%s1985_s7 + $0x30] sm:$0xff]  ;;  %v288_v17 = vld [vmem:[%s1985_s7 + $0x38] sm:$0xff] }
  0x59   : > { %v2003_v12 = vpack.c.bf16 %v308_v6, %v305_v5  ;;  %v320_v15 = vand.u32 4294901760, %v286_v11  ;;  %v323_v19 = vand.u32 4294901760, %v287_v16  ;;  %v326_v20 = vand.u32 4294901760, %v288_v17  ;;  %v2020_v21 = vld [vmem:[%s1985_s7 + $0x40] sm:$0xff]  ;;  %v2023_v22 = vld [vmem:[%s1985_s7 + $0x48] sm:$0xff]  ;;  %v280_v26 = vld [vmem:[%s1977_s18] sm:$0xff] }
  0x5a   : > { %v2007_v13 = vpack.c.bf16 %v314_v9, %v311_v8  ;;  %v329_v24 = vand.u32 4294901760, %v2020_v21  ;;  %v332_v25 = vand.u32 4294901760, %v2023_v22  ;;  %v2035_v27 = vld [vmem:[%s1985_s7 + $0x50] sm:$0xff]  ;;  %v2038_v28 = vld [vmem:[%s1985_s7 + $0x58] sm:$0xff]  ;;  %v2040_v29 = vsub.f32 %v281_v2, %v305_v5  ;;  %v2053_v35 = vld [vmem:[%s1985_s7 + $0x60] sm:$0xff]  ;;  %s275_s24 = scalar_select %p274_p13, %s1778_s15, 3 }
  0x5b   : > { %1416 = vmatpush3.bf16.msra.mxu1 %v2003_v12  ;;  %1488 = vmatpush3.bf16.msra.mxu0 %v2003_v12  ;;  %v2015_v18 = vpack.c.bf16 %v320_v15, %v317_v14  ;;  %v2027_v23 = vpack.c.bf16 %v326_v20, %v323_v19  ;;  %v2042_v30 = vand.u32 4294901760, %v280_v26  ;;  %v2044_v31 = vsub.f32 %v282_v3, %v308_v6  ;;  %v2058_v36 = vld [vmem:[%s1985_s7 + $0x68] sm:$0xff]  ;;  %v2078_v43 = vld [vmem:[%s1985_s7 + $0x70] sm:$0xff]  ;;  %v2081_v44 = vld [vmem:[%s1985_s7 + $0x78] sm:$0xff]  ;;  %s1098_s11 = sshll.u32 %s1778_s15, 7  ;;  %s273_s19 = scalar_lea.vmem [#allocation7], %s1093_s4 }
  0x5c   : > { %1417 = vmatprep.subr.bf16.mxu1 %v1792_v0  ;;  %1489 = vmatprep.subr.bf16.mxu0 %v1792_v0  ;;  %v2048_v32 = vpack.c.bf16 %v332_v25, %v329_v24  ;;  %v335_v33 = vand.u32 4294901760, %v2035_v27  ;;  %v338_v34 = vand.u32 4294901760, %v2038_v28  ;;  %v2060_v37 = vsub.f32 %v283_v4, %v311_v8  ;;  %s279_s6 = scalar_lea.vmem %s2316_s2, %s275_s24  ;;  %s962_s21 = sshll.u32 %s273_s19, 4  ;;  %s2268_s21 = int_to_ptr.vmem [resolvable:$true] %s962_s21 }
  0x5d   : > { %v2062_v38 = vsub.f32 %v284_v7, %v314_v9  ;;  %v341_v39 = vand.u32 4294901760, %v2053_v35  ;;  %v2066_v40 = vsub.f32 %v280_v26, %v2042_v30  ;;  %v344_v42 = vand.u32 4294901760, %v2058_v36  ;;  %s2266_s10 = scalar_lea.hbm %s2317_s3, %s1098_s11  ;;  %s947_s5 = scalar_lea.sflag [#allocation4], %s1971_s30 }
  0x5e   : > { %v2074_v41 = vpack.c.bf16 %v338_v34, %v335_v33  ;;  %v398_v45 = vand.u32 4294901760, %v2040_v29  ;;  %v405_v46 = vand.u32 4294901760, %v2044_v31  ;;  %v2087_v47 = vsub.f32 %v285_v10, %v317_v14  ;;  %s1700_s15 = scalar_lea.vmem %s2268_s21, 128  ;;  %p2329_p6 = scmp.ne.s32.totalorder %s2322_s25, 0 }
  0x5f   : > { %1419 = vmatpush3.bf16.msra.mxu1 %v2007_v13  ;;  %1491 = vmatpush3.bf16.msra.mxu0 %v2007_v13  ;;  %v2089_v48 = vsub.f32 %v286_v11, %v320_v15  ;;  %v347_v49 = vand.u32 4294901760, %v2078_v43  ;;  %v350_v50 = vand.u32 4294901760, %v2081_v44  ;;  %v387_v51 = vand.u32 4294901760, %v2066_v40  ;;  %p1701_p3 = scmp.ne.s32.totalorder %s2268_s21, %s1700_s15  ;;  %s1795_s4 = smov [#allocation7]  }
  0x60   : > { %1420 = vmatprep.subr.bf16.mxu1 %v1792_v0  ;;  %1492 = vmatprep.subr.bf16.mxu0 %v1792_v0  ;;  %v412_v52 = vand.u32 4294901760, %v2060_v37  ;;  %v2101_v53 = vpack.c.bf16 %v344_v42, %v341_v39  ;;  %v399_v54 = vsub.f32 %v2040_v29, %v398_v45  ;;  %v406_v55 = vsub.f32 %v2044_v31, %v405_v46  ;;  %s1704_s18 = sshll.u32 %s1795_s4, 4  ;;  %s1705_s18 = int_to_ptr.vmem [resolvable:$false] %s1704_s18 }
  0x61   : > { %v419_v56 = vand.u32 4294901760, %v2062_v38  ;;  %v2108_v57 = vsub.f32 %v287_v16, %v323_v19  ;;  %v2110_v58 = vsub.f32 %v288_v17, %v326_v20  ;;  %v388_v59 = vsub.f32 %v2066_v40, %v387_v51  ;;  %p1702_p12 = pnand %p1701_p3, %p2329_p6  ;;  %s1706_s28 = scalar_lea.vmem %s1705_s18, 256 }
  0x62   : > { %v413_v60 = vsub.f32 %v2060_v37, %v412_v52  ;;  %v426_v61 = vand.u32 4294901760, %v2087_v47  ;;  %v433_v62 = vand.u32 4294901760, %v2089_v48  ;;  %v2122_v63 = vpack.c.bf16 %v350_v50, %v347_v49  ;;  %p1707_p10 = scmp.lt.s32.totalorder %s2268_s21, %s1705_s18  ;;  %p1708_p0 = scmp.lt.s32.totalorder %s1706_s28, %s1700_s15 }
  0x63   : > { %1422 = vmatpush3.bf16.msra.mxu1 %v2015_v18  ;;  %1494 = vmatpush3.bf16.msra.mxu0 %v2015_v18  ;;  %v400_v2 = vand.u32 4294901760, %v399_v54  ;;  %v407_v3 = vand.u32 4294901760, %v406_v55  ;;  %v420_v4 = vsub.f32 %v2062_v38, %v419_v56  ;;  %v2128_v5 = vsub.f32 %v2020_v21, %v329_v24  ;;  %p1703_p7 = pneg %p1702_p12 }
  0x64   : > { %1423 = vmatprep.subr.bf16.mxu1 %v1792_v0  ;;  %1495 = vmatprep.subr.bf16.mxu0 %v1792_v0  ;;  %v2131_v6 = vsub.f32 %v2023_v22, %v332_v25  ;;  %v1511_v7 = vpack.c.bf16 %v405_v46, %v398_v45  ;;  %v389_v8 = vand.u32 4294901760, %v388_v59  ;;  %v414_v9 = vand.u32 4294901760, %v413_v60  ;;  %p1709_p1 = por %p1708_p0, %p1707_p10 }
  0x65   : > { %v427_v10 = vsub.f32 %v2087_v47, %v426_v61  ;;  %v434_v11 = vsub.f32 %v2089_v48, %v433_v62  ;;  %v1439_v14 = vpack.c.bf16 %v407_v3, %v400_v2  ;;  %v421_v15 = vand.u32 4294901760, %v420_v4 }
  0x66   : > { %v440_v16 = vand.u32 4294901760, %v2108_v57  ;;  %v447_v17 = vand.u32 4294901760, %v2110_v58  ;;  %v2144_v19 = vsub.f32 %v2035_v27, %v335_v33  ;;  %v2149_v20 = vsub.f32 %v2038_v28, %v338_v34  ;;  %p1710_p9 = pnand %p1709_p1, %p1703_p7 }
  0x67   : > { %1425 = vmatpush3.bf16.msra.mxu1 %v2027_v23  ;;  %1497 = vmatpush3.bf16.msra.mxu0 %v2027_v23  ;;  %v1514_v21 = vpack.c.bf16 %v419_v56, %v412_v52  ;;  %v428_v22 = vand.u32 4294901760, %v427_v10  ;;  %v435_v24 = vand.u32 4294901760, %v434_v11  ;;  %v454_v25 = vand.u32 4294901760, %v2128_v5 }
  0x68   : > { %1426 = vmatprep.subr.bf16.mxu1 %v1792_v0  ;;  %1498 = vmatprep.subr.bf16.mxu0 %v1792_v0  ;;  %v1442_v26 = vpack.c.bf16 %v421_v15, %v414_v9  ;;  %v441_v45 = vsub.f32 %v2108_v57, %v440_v16  ;;  %v448_v27 = vsub.f32 %v2110_v58, %v447_v17  ;;  %v461_v33 = vand.u32 4294901760, %v2131_v6 }
  0x69   : > { %v2160_v28 = vsub.f32 %v2053_v35, %v341_v39  ;;  %v2165_v34 = vsub.f32 %v2058_v36, %v344_v42  ;;  %v1445_v46 = vpack.c.bf16 %v435_v24, %v428_v22  ;;  %v455_v52 = vsub.f32 %v2128_v5, %v454_v25 }
  0x6a   : > { %v468_v54 = vand.u32 4294901760, %v2144_v19  ;;  %v442_v35 = vand.u32 4294901760, %v441_v45  ;;  %v449_v39 = vand.u32 4294901760, %v448_v27  ;;  %v462_v55 = vsub.f32 %v2131_v6, %v461_v33 }
  0x6b   : > { %1428 = vmatpush3.bf16.msra.mxu1 %v2048_v32  ;;  %1500 = vmatpush3.bf16.msra.mxu0 %v2048_v32  ;;  %v475_v36 = vand.u32 4294901760, %v2149_v20  ;;  %v2180_v42 = vsub.f32 %v2078_v43, %v347_v49  ;;  %v2185_v56 = vsub.f32 %v2081_v44, %v350_v50  ;;  %v1520_v59 = vpack.c.bf16 %v447_v17, %v440_v16 }
  0x6c   : > { %1429 = vmatprep.subr.bf16.mxu1 %v1792_v0  ;;  %1501 = vmatprep.subr.bf16.mxu0 %v1792_v0  ;;  %v456_v60 = vand.u32 4294901760, %v455_v52  ;;  %v1448_v2 = vpack.c.bf16 %v449_v39, %v442_v35  ;;  %v463_v3 = vand.u32 4294901760, %v462_v55  ;;  %v489_v43 = vand.u32 4294901760, %v2165_v34 }
  0x6d   : > { %v476_v4 = vsub.f32 %v2149_v20, %v475_v36  ;;  %v1523_v44 = vpack.c.bf16 %v461_v33, %v454_v25  ;;  %v503_v11 = vand.u32 4294901760, %v2185_v56 }
  0x6e   : > { %v490_v10 = vsub.f32 %v2165_v34, %v489_v43 }
  0x6f   : > { %1431 = vmatpush3.bf16.msra.mxu1 %v2074_v41  ;;  %1503 = vmatpush3.bf16.msra.mxu0 %v2074_v41  ;;  %v477_v9 = vand.u32 4294901760, %v476_v4  ;;  %v504_v22 = vsub.f32 %v2185_v56, %v503_v11 }
  0x70   : > { %1432 = vmatprep.subr.bf16.mxu1 %v1792_v0  ;;  %1504 = vmatprep.subr.bf16.mxu0 %v1792_v0  ;;  %v491_v17 = vand.u32 4294901760, %v490_v10 }
  0x71   : > { %v505_v45 = vand.u32 4294901760, %v504_v22 }
  0x73   : > { %1434 = vmatpush3.bf16.msra.mxu1 %v2101_v53  ;;  %1506 = vmatpush3.bf16.msra.mxu0 %v2101_v53 }
  0x74   : > { %1435 = vmatprep.subr.bf16.mxu1 %v1792_v0  ;;  %1507 = vmatprep.subr.bf16.mxu0 %v1792_v0 }
  0x77   : > { %1437 = vmatpush3.bf16.msra.mxu1 %v2122_v63  ;;  %1509 = vmatpush3.bf16.msra.mxu0 %v2122_v63 }
  0x78   : > { %1438 = vmatprep.subr.bf16.mxu1 %v1792_v0  ;;  %1510 = vmatprep.subr.bf16.mxu0 %v1792_v0 }
  0x7a   : > { %1237 = vmatmul.mubr.f32.vlgmr.msra.gmra.mrb[0].mxu1 %v389_v8  ;;  %1342 = vmatmul.mubr.f32.vlgmr.msra.gmra.mrb[0].mxu0 %v387_v51  ;;  %v1517_v51 = vpack.c.bf16 %v433_v62, %v426_v61  ;;  %v469_v61 = vsub.f32 %v2144_v19, %v468_v54  ;;  %v482_v62 = vand.u32 4294901760, %v2160_v28  ;;  %v1451_v8 = vpack.c.bf16 %v463_v3, %v456_v60 }
  0x7b   : > { %1440 = vmatpush3.bf16.msra.mxu1 %v1439_v14  ;;  %1512 = vmatpush3.bf16.msra.mxu0 %v1511_v7  ;;  %v496_v7 = vand.u32 4294901760, %v2180_v42  ;;  %v1526_v14 = vpack.c.bf16 %v475_v36, %v468_v54 }
  0x7c   : > { %1441 = vmatprep.subr.bf16.mxu1 %v1792_v0  ;;  %1513 = vmatprep.subr.bf16.mxu0 %v1792_v0  ;;  %v470_v49 = vand.u32 4294901760, %v469_v61  ;;  %v483_v50 = vsub.f32 %v2160_v28, %v482_v62  ;;  %v1529_v25 = vpack.c.bf16 %v489_v43, %v482_v62 }
  0x7d   : > { %1271 = vmatprep.mubr.msk.f32.mxu1 %vm1793_vm0, %v1794_v1  ;;  %1376 = vmatprep.mubr.msk.f32.mxu0 %vm1793_vm0, %v1794_v1  ;;  %v1532_v33 = vpack.c.bf16 %v503_v11, %v496_v7 }
  0x7e   : > { %v484_v15 = vand.u32 4294901760, %v483_v50  ;;  %v1454_v16 = vpack.c.bf16 %v477_v9, %v470_v49 }
  0x7f   : > { %1443 = vmatpush3.bf16.msra.mxu1 %v1442_v26  ;;  %1515 = vmatpush3.bf16.msra.mxu0 %v1514_v21  ;;  %v497_v21 = vsub.f32 %v2180_v42, %v496_v7 }
  0x80   : > { %1444 = vmatprep.subr.bf16.mxu1 %v1792_v0  ;;  %1516 = vmatprep.subr.bf16.mxu0 %v1792_v0  ;;  %v1457_v24 = vpack.c.bf16 %v491_v17, %v484_v15 }
  0x81   : > { %v498_v26 = vand.u32 4294901760, %v497_v21 }
  0x83   : > { %1446 = vmatpush3.bf16.msra.mxu1 %v1445_v46  ;;  %1518 = vmatpush3.bf16.msra.mxu0 %v1517_v51  ;;  %v1460_v27 = vpack.c.bf16 %v505_v45, %v498_v26  ;;  %v1463_v46 = vpack.c.bf16 %v2044_v31, %v2040_v29  ;;  %v1466_v51 = vpack.c.bf16 %v2062_v38, %v2060_v37  ;;  %v1096_v31 = vld [vmem:[%s279_s6] ss:$0 sm:$0xff] }
  0x84   : > { %1447 = vmatprep.subr.bf16.mxu1 %v1792_v0  ;;  %1519 = vmatprep.subr.bf16.mxu0 %v1792_v0  ;;  %v1469_v29 = vpack.c.bf16 %v2089_v48, %v2087_v47 }
  0x87   : > { %1449 = vmatpush3.bf16.msra.mxu1 %v1448_v2  ;;  %1521 = vmatpush3.bf16.msra.mxu0 %v1520_v59 }
  0x88   : > { %1450 = vmatprep.subr.bf16.mxu1 %v1792_v0  ;;  %1522 = vmatprep.subr.bf16.mxu0 %v1792_v0 }
  0x8b   : > { %1452 = vmatpush3.bf16.msra.mxu1 %v1451_v8  ;;  %1524 = vmatpush3.bf16.msra.mxu0 %v1523_v44 }
  0x8c   : > { %1453 = vmatprep.subr.bf16.mxu1 %v1792_v0  ;;  %1525 = vmatprep.subr.bf16.mxu0 %v1792_v0 }
  0x8f   : > { %1455 = vmatpush3.bf16.msra.mxu1 %v1454_v16  ;;  %1527 = vmatpush3.bf16.msra.mxu0 %v1526_v14 }
  0x90   : > { %1456 = vmatprep.subr.bf16.mxu1 %v1792_v0  ;;  %1528 = vmatprep.subr.bf16.mxu0 %v1792_v0 }
  0x93   : > { %1458 = vmatpush3.bf16.msra.mxu1 %v1457_v24  ;;  %1530 = vmatpush3.bf16.msra.mxu0 %v1529_v25 }
  0x94   : > { %1459 = vmatprep.subr.bf16.mxu1 %v1792_v0  ;;  %1531 = vmatprep.subr.bf16.mxu0 %v1792_v0 }
  0x97   : > { %1461 = vmatpush3.bf16.msra.mxu1 %v1460_v27  ;;  %1533 = vmatpush3.bf16.msra.mxu0 %v1532_v33 }
  0x98   : > { %1462 = vmatprep.subr.bf16.mxu1 %v1792_v0  ;;  %1534 = vmatprep.subr.bf16.mxu0 %v1792_v0 }
  0x9a   : > { %1272 = vmatmul.mubr.f32.vlgmr.msra.gmra.mrb[0].mxu1 %v2042_v30  ;;  %1377 = vmatmul.mubr.f32.vlgmr.msra.gmra.mrb[0].mxu0 %v2042_v30 }
  0x9b   : > { %1464 = vmatpush3.bf16.msra.mxu1 %v1463_v46  ;;  %1536 = vmatpush3.bf16.msra.mxu0 %v2003_v12  ;;  %v1472_v12 = vpack.c.bf16 %v2110_v58, %v2108_v57 }
  0x9c   : > { %1465 = vmatprep.subr.bf16.mxu1 %v1792_v0  ;;  %1537 = vmatprep.subr.bf16.mxu0 %v1792_v0 }
  0x9d   : > { %1306 = vmatprep.mubr.msk.f32.mxu1 %vm1793_vm0, %v1794_v1  ;;  %1411 = vmatprep.mubr.msk.f32.mxu0 %vm1793_vm0, %v1794_v1  ;;  %v1475_v1 = vpack.c.bf16 %v2131_v6, %v2128_v5 }
  0x9f   : > { %1467 = vmatpush3.bf16.msra.mxu1 %v1466_v51  ;;  %1539 = vmatpush3.bf16.msra.mxu0 %v2007_v13  ;;  %v1478_v13 = vpack.c.bf16 %v2149_v20, %v2144_v19 }
  0xa0   : > { %1468 = vmatprep.subr.bf16.mxu1 %v1792_v0  ;;  %1540 = vmatprep.subr.bf16.mxu0 %v1792_v0 }
  0xa3   : > { %1470 = vmatpush3.bf16.msra.mxu1 %v1469_v29  ;;  %1542 = vmatpush3.bf16.msra.mxu0 %v2015_v18  ;;  %v1481_v18 = vpack.c.bf16 %v2165_v34, %v2160_v28 }
  0xa4   : > { %1471 = vmatprep.subr.bf16.mxu1 %v1792_v0  ;;  %1543 = vmatprep.subr.bf16.mxu0 %v1792_v0 }
  0xa7   : > { %1473 = vmatpush3.bf16.msra.mxu1 %v1472_v12  ;;  %1545 = vmatpush3.bf16.msra.mxu0 %v2027_v23  ;;  %v1484_v23 = vpack.c.bf16 %v2185_v56, %v2180_v42 }
  0xa8   : > { %1474 = vmatprep.subr.bf16.mxu1 %v1792_v0  ;;  %1546 = vmatprep.subr.bf16.mxu0 %v1792_v0 }
  0xab   : > { %1476 = vmatpush3.bf16.msra.mxu1 %v1475_v1  ;;  %1548 = vmatpush3.bf16.msra.mxu0 %v2048_v32 }
  0xac   : > { %1477 = vmatprep.subr.bf16.mxu1 %v1792_v0  ;;  %1549 = vmatprep.subr.bf16.mxu0 %v1792_v0 }
  0xaf   : > { %1479 = vmatpush3.bf16.msra.mxu1 %v1478_v13  ;;  %1551 = vmatpush3.bf16.msra.mxu0 %v2074_v41 }
  0xb0   : > { %1480 = vmatprep.subr.bf16.mxu1 %v1792_v0  ;;  %1552 = vmatprep.subr.bf16.mxu0 %v1792_v0 }
  0xb3   : > { %1482 = vmatpush3.bf16.msra.mxu1 %v1481_v18  ;;  %1554 = vmatpush3.bf16.msra.mxu0 %v2101_v53 }
  0xb4   : > { %1483 = vmatprep.subr.bf16.mxu1 %v1792_v0  ;;  %1555 = vmatprep.subr.bf16.mxu0 %v1792_v0 }
  0xb7   : > { %1485 = vmatpush3.bf16.msra.mxu1 %v1484_v23  ;;  %1557 = vmatpush3.bf16.msra.mxu0 %v2122_v63 }
  0xba   : > { %1307 = vmatmul.mubr.f32.vlgmr.msra.gmra.mrb[0].mxu1 %v2066_v40  ;;  %1412 = vmatmul.mubr.f32.vlgmr.msra.gmra.mrb[0].mxu0 %v2042_v30 }
 0x18d   : > { %v646_v32 = vpop.f32.mrb[0].mxu1  ;;  %v941_v37 = vpop.f32.mrb[0].mxu0 }
 0x18e   : > { %v1558_v0 = vadd.f32 %v1096_v31, %v646_v32  ;;  %v1308_v38 = vpop.f32.mrb[1].mxu1  ;;  %v1413_v40 = vpop.f32.mrb[1].mxu0 }
 0x190   : > { %v1559_v41 = vadd.f32 %v1558_v0, %v941_v37 }
 0x192   : > { %945 = vst [vmem:[%s273_s19] sm:$0xff] %v1559_v41 }
 0x193   : > { %1713 = shalt.err (!%p1710_p9)
}
 0x194   : > { %s1714_s30 = scalar_lea.hbm %s2266_s10, 128  ;;  %s1718_s24 = scalar_lea.hbm %s2317_s3, 512 }
 0x195   : > { %p1715_p11 = scmp.ne.s32.totalorder %s2266_s10, %s1714_s30  ;;  %p1719_p4 = scmp.lt.u32.totalorder %s2266_s10, %s2317_s3 }
 0x196   : > { %p1720_p8 = scmp.lt.u32.totalorder %s1718_s24, %s1714_s30  ;;  %p1722_p3 = scmp.lt.u32.totalorder %s1714_s30, %s2266_s10 }
 0x197   : > { %p1716_p2 = pnand %p1715_p11, %p2329_p6 }
 0x198   : > { %p1721_p13 = por %p1720_p8, %p1719_p4 }
 0x199   : > { %p1717_p5 = pneg %p1716_p2 }
 0x19a   : > { %p1723_p12 = por %p1722_p3, %p1721_p13 }
 0x19c   : > { %p1724_p7 = pnand %p1723_p12, %p1717_p5 }
 0x19e   : > { %1727 = shalt.err (!%p1724_p7)
}
 0x19f   : > { %1572 = dma.vmem_to_hbm [thread:$0]  (%p2329_p6), %s2268_s21, 128, %s2266_s10, %s947_s5  }
 0x1a0 PF: > { %p1586_p10 = scmp.ge.s32.totalorder %s1786_s17, 2  ;;  %s974_s6 = sand.u32 1, %s1766_s12  }
 0x1a1   : > { %p2330_p0 = scmp.ne.s32.totalorder %s2323_s27, 0  ;;  %s975_s11 = scalar_lea.sflag [#allocation4], %s974_s6 }
 0x1a3   : > { %p1582_p1 = pnand %p1586_p10, %p2330_p0 }
 0x1a5   : > { %1761 = dma.done.wait (!%p1582_p1), %s975_s11, 128  }
 0x1a6   : > { %1763 = vsyncadd (!%p1582_p1), %s975_s11, 4294967168  ;;  %s22_s17 = sadd.s32 1, %s1786_s17   ;;  %s2331_s12 = smov %s1770_s13 }
 0x1a7   : > { %p19_p9 = scmp.ge.s32.totalorder %s22_s17, 6   ;;  %s2332_s13 = smov %s1774_s14 }
 0x1a8   : > { %s2333_s14 = smov %s1872_s26  ;;  %s2334_s15 = smov %s1782_s16 }
 0x1a9   : > { %s2335_s16 = smov %s2337_s20  ;;  %21 = sbr.rel (!%p19_p9) target bundleno = 8 (0x8), region = 93 }
 0x1b0   :  { %980 = vsyncpa [#allocation3], 1 }
 0x1b1   :  { %982 = vsyncpa [#allocation3 + $0x1], 1 }
 0x1b2   :  { %983 = vsyncpa [#allocation6], 1 }
 0x1b3   :  { %985 = vsyncpa [#allocation6 + $0x1], 1 }
 0x1b4   :  { %986 = vsyncpa [#allocation4], 1 }
 0x1b5   :  { %988 = vsyncpa [#allocation4 + $0x1], 1 }

</bundles_post_ra>
